<compile_context>
chip_gen: v7x
topology: tpu7x:2x2x1
jax: 0.10.0
libtpu: 0.0.40
codegen_flags: <defaults>
</compile_context>

<pallas_src>
import functools

import jax
import jax.numpy as jnp
from jax.experimental import pallas as pl
from jax.experimental.pallas import tpu as pltpu

_NEG_BIG = -1e30  # padded-action logit bias; exp underflows to exactly 0 in f32


def _round_up(x: int, m: int) -> int:
    return ((x + m - 1) // m) * m


def policy_kernel(x_ref, w1_ref, b1_ref, w2_ref, b2_ref, out_ref, *, approx_recip):
    # x:   [TB, D_in]   (f32; cast to the MXU dtype in-kernel)
    # w1:  [D_in, H]    (pre-transposed, f32 or bf16)
    # b1:  [1, H]       (f32)
    # w2:  [H, A_pad]   (pre-transposed, zero-padded cols, f32 or bf16)
    # b2:  [1, A_pad]   (f32, padded entries = -1e30)
    # out: [TB, A_pad]  (lane-dense: A_pad is a multiple of 128)
    mxu_dtype = w1_ref.dtype
    x = x_ref[...].astype(mxu_dtype)

    # ---- Linear 1 + ReLU (plain [TB,D_in] x [D_in,H] contraction) ----
    h = jnp.dot(x, w1_ref[...], preferred_element_type=jnp.float32)
    h = jnp.maximum(h + b1_ref[...], 0.0)

    # ---- Linear 2: [TB,H] x [H,A_pad] ----
    logits = jnp.dot(h.astype(mxu_dtype), w2_ref[...],
                     preferred_element_type=jnp.float32)
    logits = logits + b2_ref[...]

    # ---- Numerically stable softmax over the (padded) action lanes ----
    m = jnp.max(logits, axis=-1, keepdims=True)
    e = jnp.exp(logits - m)                       # padded lanes -> exactly 0
    denom = jnp.sum(e, axis=-1, keepdims=True)
    if approx_recip:
        inv = pl.reciprocal(denom, approx=True)   # EUP slot; ~2^-12 rel. error
    else:
        inv = 1.0 / denom                         # exact
    out_ref[...] = (e * inv).astype(out_ref.dtype)


def prepare_policy_params(w1, b1, w2, b2, *, mxu_dtype=jnp.bfloat16):
    """One-time param packing (outside the hot path).

    Pre-transposes weights to [in, out] layout so both in-kernel matmuls are
    plain row-major contractions, casts them to the MXU dtype, and pads the
    action dim to a multiple of 128 (lane-dense output).  Padded actions get a
    -1e30 bias so softmax assigns them exactly 0.
    """
    H, D_in = w1.shape
    A = w2.shape[0]
    A_pad = _round_up(max(A, 1), 128)

    w1t = jnp.asarray(w1, jnp.float32).T                      # [D_in, H]
    w2t = jnp.zeros((H, A_pad), jnp.float32).at[:, :A].set(
        jnp.asarray(w2, jnp.float32).T)                       # [H, A_pad]
    b2p = jnp.full((1, A_pad), _NEG_BIG, jnp.float32).at[0, :A].set(
        jnp.asarray(b2, jnp.float32))

    return {
        "w1": w1t.astype(mxu_dtype),                          # [D_in, H]
        "b1": jnp.asarray(b1, jnp.float32).reshape(1, H),     # [1, H]
        "w2": w2t.astype(mxu_dtype),                          # [H, A_pad]
        "b2": b2p,                                            # [1, A_pad]
        "action_space": A,
    }


def policy_forward(state, params, *, tb=None, approx_recip=False,
                   out_dtype=jnp.float32):
    """state: [B, input_dim] f32.  Returns softmax probs [B, action_space]."""
    x = jnp.asarray(state, jnp.float32)
    B, D_in = x.shape
    H = params["w1"].shape[1]
    A_pad = params["w2"].shape[1]
    A = params["action_space"]

    if tb is None:
        # Large batch tiles amortize the ~0.35 us/step fixed overhead; VMEM use
        # at tb=2048 is ~3 MiB, far below every generation's limit.
        tb = min(2048, _round_up(B, 8))
        # Keep >= 2 grid steps (v7x megacore) when it costs no extra padding.
        if B >= 16:
            half = _round_up((B + 1) // 2, 8)
            if 2 * half == _round_up(B, 8):
                tb = min(tb, half)
    tb = max(8, _round_up(tb, 8))
    B_pad = _round_up(B, tb)
    if B_pad != B:
        x = jnp.pad(x, ((0, B_pad - B), (0, 0)))
    grid = (B_pad // tb,)

    # Weights/biases: same block every step -> DMA'd once, VMEM-resident.
    resident = lambda shape: pl.BlockSpec(shape, lambda i: (0, 0))

    w_itemsize = jnp.dtype(params["w1"].dtype).itemsize
    out_itemsize = jnp.dtype(out_dtype).itemsize
    weight_bytes = ((params["w1"].size + params["w2"].size) * w_itemsize
                    + (params["b1"].size + params["b2"].size) * 4)
    cost = pl.CostEstimate(
        flops=2 * B_pad * (D_in * H + H * A_pad),
        transcendentals=B_pad * A_pad,
        bytes_accessed=B_pad * D_in * 4 + B_pad * A_pad * out_itemsize + weight_bytes,
    )

    # Per-step double-buffered VMEM estimate; only raise the scoped limit when a
    # user-supplied tb would exceed v5e's 16 MiB default (never at default tb).
    vmem_est = 2 * (tb * D_in * 4 + tb * A_pad * out_itemsize) + 2 * weight_bytes
    vmem_limit = min(int(vmem_est * 1.5), 64 << 20) if vmem_est > (12 << 20) else None

    out = pl.pallas_call(
        functools.partial(policy_kernel, approx_recip=approx_recip),
        out_shape=jax.ShapeDtypeStruct((B_pad, A_pad), out_dtype),
        grid=grid,
        in_specs=[
            pl.BlockSpec((tb, D_in), lambda i: (i, 0)),   # x tiles, double-buffered
            resident((D_in, H)),
            resident((1, H)),
            resident((H, A_pad)),
            resident((1, A_pad)),
        ],
        out_specs=pl.BlockSpec((tb, A_pad), lambda i: (i, 0)),
        compiler_params=pltpu.CompilerParams(
            dimension_semantics=("parallel",),   # shard batch across v7x's 2 TCs
            vmem_limit_bytes=vmem_limit,
        ),
        cost_estimate=cost,
    )(x, params["w1"], params["b1"], params["w2"], params["b2"])

    return out[:B, :A]


def init_policy_params(key, input_dim, action_space, hidden_dim=128):
    """Kaiming-normal weights (fan_in, gain=sqrt(2)), zero biases — matches init_layer."""
    k1, k2 = jax.random.split(key)
    std1 = (2.0 / input_dim) ** 0.5
    std2 = (2.0 / hidden_dim) ** 0.5
    w1 = std1 * jax.random.normal(k1, (hidden_dim, input_dim), jnp.float32)
    b1 = jnp.zeros((hidden_dim,), jnp.float32)
    w2 = std2 * jax.random.normal(k2, (action_space, hidden_dim), jnp.float32)
    b2 = jnp.zeros((action_space,), jnp.float32)
    return w1, b1, w2, b2


if __name__ == "__main__":
    key = jax.random.PRNGKey(0)
    k_params, k_state = jax.random.split(key)

    batch = 16          # tb heuristic picks 8 -> 2 grid steps, no batch padding
    input_dim = 32
    action_space = 8
    hidden_dim = 128

    w1, b1, w2, b2 = init_policy_params(k_params, input_dim, action_space, hidden_dim)
    state = jax.random.normal(k_state, (batch, input_dim), jnp.float32)

    # Plain-JAX reference (same math as the PyTorch module).
    h_ref = jnp.maximum(state @ w1.T + b1, 0.0)
    probs_ref = jax.nn.softmax(h_ref @ w2.T + b2, axis=-1)

    # --- f32 MXU path, exact reciprocal (accuracy check) ---
    params_f32 = prepare_policy_params(w1, b1, w2, b2, mxu_dtype=jnp.float32)
    probs_f32 = policy_forward(state, params_f32, approx_recip=False)
    jax.block_until_ready(probs_f32)
    assert probs_f32.shape == (batch, action_space)
    assert jnp.allclose(probs_f32, probs_ref, atol=1e-3), "f32 path mismatch vs reference"
    assert jnp.allclose(jnp.sum(probs_f32, axis=-1), 1.0, atol=1e-4)

    # --- bf16 MXU fast path (bf16 dots, f32 accumulate/softmax, approx recip) ---
    params_bf16 = prepare_policy_params(w1, b1, w2, b2, mxu_dtype=jnp.bfloat16)
    probs_bf16 = policy_forward(state, params_bf16, approx_recip=True)
    jax.block_until_ready(probs_bf16)
    assert probs_bf16.shape == (batch, action_space)
    assert jnp.allclose(probs_bf16, probs_ref, atol=5e-2), "bf16 path mismatch vs reference"
    assert jnp.allclose(jnp.sum(probs_bf16, axis=-1), 1.0, atol=5e-3)

    print("KERNEL_OK")
</pallas_src>

<mosaic_0001>
module attributes {stable_mosaic.version = 11 : i64} {
  func.func @policy_kernel(%arg0: i32, %arg1: memref<8x32xf32, #tpu.memory_space<vmem>>, %arg2: memref<32x128xf32, #tpu.memory_space<vmem>>, %arg3: memref<1x128xf32, #tpu.memory_space<vmem>>, %arg4: memref<128x128xf32, #tpu.memory_space<vmem>>, %arg5: memref<1x128xf32, #tpu.memory_space<vmem>>, %arg6: memref<8x128xf32, #tpu.memory_space<vmem>>) attributes {dimension_semantics = [#tpu.dimension_semantics<parallel>], iteration_bounds = array<i64: 2>, scalar_prefetch = 0 : i64, scratch_operands = 0 : i64, tpu.core_type = #tpu.core_type<tc>, window_params = [{transform_indices = @transform_0, window_bounds = array<i64: 8, 32>}, {pipeline_mode = #tpu.pipeline_mode<synchronous>, transform_indices = @transform_1, window_bounds = array<i64: 32, 128>}, {pipeline_mode = #tpu.pipeline_mode<synchronous>, transform_indices = @transform_2, window_bounds = array<i64: 1, 128>}, {pipeline_mode = #tpu.pipeline_mode<synchronous>, transform_indices = @transform_3, window_bounds = array<i64: 128, 128>}, {pipeline_mode = #tpu.pipeline_mode<synchronous>, transform_indices = @transform_4, window_bounds = array<i64: 1, 128>}, {transform_indices = @transform_5, window_bounds = array<i64: 8, 128>}]} {
    %c0 = arith.constant 0 : index
    %c0_0 = arith.constant 0 : index
    %0 = vector.load %arg1[%c0, %c0_0] : memref<8x32xf32, #tpu.memory_space<vmem>>, vector<8x32xf32>
    %c0_1 = arith.constant 0 : index
    %c0_2 = arith.constant 0 : index
    %1 = vector.load %arg2[%c0_1, %c0_2] : memref<32x128xf32, #tpu.memory_space<vmem>>, vector<32x128xf32>
    %cst = arith.constant dense<0.000000e+00> : vector<8x128xf32>
    %2 = tpu.matmul %0, %1, %cst {dimension_numbers = #tpu.dot_dimension_numbers<[1], [0], [0], [1], [0, 0, 1, 1], [], []>} : vector<8x32xf32>, vector<32x128xf32>, vector<8x128xf32> -> vector<8x128xf32>
    %c0_3 = arith.constant 0 : index
    %c0_4 = arith.constant 0 : index
    %3 = vector.load %arg3[%c0_3, %c0_4] : memref<1x128xf32, #tpu.memory_space<vmem>>, vector<1x128xf32>
    %4 = vector.broadcast %3 : vector<1x128xf32> to vector<8x128xf32>
    %5 = arith.addf %2, %4 : vector<8x128xf32>
    %cst_5 = arith.constant 0.000000e+00 : f32
    %6 = vector.broadcast %cst_5 : f32 to vector<8x128xf32>
    %7 = arith.maximumf %5, %6 : vector<8x128xf32>
    %c0_6 = arith.constant 0 : index
    %c0_7 = arith.constant 0 : index
    %8 = vector.load %arg4[%c0_6, %c0_7] : memref<128x128xf32, #tpu.memory_space<vmem>>, vector<128x128xf32>
    %cst_8 = arith.constant dense<0.000000e+00> : vector<8x128xf32>
    %9 = tpu.matmul %7, %8, %cst_8 {dimension_numbers = #tpu.dot_dimension_numbers<[1], [0], [0], [1], [0, 0, 1, 1], [], []>} : vector<8x128xf32>, vector<128x128xf32>, vector<8x128xf32> -> vector<8x128xf32>
    %c0_9 = arith.constant 0 : index
    %c0_10 = arith.constant 0 : index
    %10 = vector.load %arg5[%c0_9, %c0_10] : memref<1x128xf32, #tpu.memory_space<vmem>>, vector<1x128xf32>
    %11 = vector.broadcast %10 : vector<1x128xf32> to vector<8x128xf32>
    %12 = arith.addf %9, %11 : vector<8x128xf32>
    %cst_11 = arith.constant dense<0xFF800000> : vector<8xf32>
    %13 = vector.multi_reduction <maximumf>, %12, %cst_11 [1] : vector<8x128xf32> to vector<8xf32>
    %14 = vector.shape_cast %13 : vector<8xf32> to vector<8x1xf32>
    %15 = vector.broadcast %14 : vector<8x1xf32> to vector<8x128xf32>
    %16 = arith.subf %12, %15 : vector<8x128xf32>
    %17 = math.exp %16 : vector<8x128xf32>
    %cst_12 = arith.constant dense<0.000000e+00> : vector<8xf32>
    %18 = vector.multi_reduction <add>, %17, %cst_12 [1] : vector<8x128xf32> to vector<8xf32>
    %19 = vector.shape_cast %18 : vector<8xf32> to vector<8x1xf32>
    %cst_13 = arith.constant 1.000000e+00 : f32
    %20 = vector.broadcast %cst_13 : f32 to vector<8x1xf32>
    %21 = arith.divf %20, %19 : vector<8x1xf32>
    %22 = vector.broadcast %21 : vector<8x1xf32> to vector<8x128xf32>
    %23 = arith.mulf %17, %22 : vector<8x128xf32>
    %c0_14 = arith.constant 0 : index
    %c0_15 = arith.constant 0 : index
    %24 = vector.load %arg6[%c0_14, %c0_15] : memref<8x128xf32, #tpu.memory_space<vmem>>, vector<8x128xf32>
    tpu.vector_store %arg6[%c0_14, %c0_15], %23 {strides = array<i32>} : memref<8x128xf32, #tpu.memory_space<vmem>>, vector<8x128xf32>,
    return
  }
  func.func @transform_0(%arg0: i32) -> (i32, i32) {
    %c0_i32 = arith.constant 0 : i32
    %c0_i32_0 = arith.constant 0 : i32
    return %arg0, %c0_i32 : i32, i32
  }
  func.func @transform_1(%arg0: i32) -> (i32, i32) {
    %c0_i32 = arith.constant 0 : i32
    %c0_i32_0 = arith.constant 0 : i32
    %c0_i32_1 = arith.constant 0 : i32
    return %c0_i32, %c0_i32_0 : i32, i32
  }
  func.func @transform_2(%arg0: i32) -> (i32, i32) {
    %c0_i32 = arith.constant 0 : i32
    %c0_i32_0 = arith.constant 0 : i32
    %c0_i32_1 = arith.constant 0 : i32
    return %c0_i32, %c0_i32_0 : i32, i32
  }
  func.func @transform_3(%arg0: i32) -> (i32, i32) {
    %c0_i32 = arith.constant 0 : i32
    %c0_i32_0 = arith.constant 0 : i32
    %c0_i32_1 = arith.constant 0 : i32
    return %c0_i32, %c0_i32_0 : i32, i32
  }
  func.func @transform_4(%arg0: i32) -> (i32, i32) {
    %c0_i32 = arith.constant 0 : i32
    %c0_i32_0 = arith.constant 0 : i32
    %c0_i32_1 = arith.constant 0 : i32
    return %c0_i32, %c0_i32_0 : i32, i32
  }
  func.func @transform_5(%arg0: i32) -> (i32, i32) {
    %c0_i32 = arith.constant 0 : i32
    %c0_i32_0 = arith.constant 0 : i32
    return %arg0, %c0_i32 : i32, i32
  }
}

</mosaic_0001>

<bundles_post_ra>
// kernel: tpu_custom_call.1
= control target key start
LH: loop header
LB: loop body
LE: loop exit
PB: predicated region body
PF: predicated region fallthrough
CT: control target
= control target key end

     0   :  { %10 = vsyncpa [#allocation3], 0  ;;  %s1195_s0 = inlined_call_operand.hbm [shape: f32[16,32], index: 0, kind: input, shape index: {}]   ;;  %s1196_s1 = inlined_call_operand.hbm [shape: f32[32,128], index: 1, kind: input, shape index: {}]   ;;  %s1197_s2 = inlined_call_operand.vmem [shape: f32[1,128], index: 2, kind: input, shape index: {}]   ;;  %s1198_s3 = inlined_call_operand.hbm [shape: f32[128,128], index: 3, kind: input, shape index: {}]   ;;  %s1199_s4 = inlined_call_operand.vmem [shape: f32[1,128], index: 4, kind: input, shape index: {}]   ;;  %s1200_s5 = inlined_call_operand.hbm [shape: f32[16,128], index: 5, kind: output, shape index: {}]  }
   0x1   :  { %12 = vsyncpa [#allocation3 + $0x1], 0 }
   0x2   :  { %13 = vsyncpa [#allocation6], 0 }
   0x3   :  { %14 = vsyncpa [#allocation4], 0 }
   0x4   :  { %16 = vsyncpa [#allocation4 + $0x1], 0  ;;  %s953_s18 = smov 0   ;;  %s955_s19 = smov 0  }
   0x5   :  { %s957_s20 = smov 0   ;;  %s959_s21 = smov 0  }
   0x6 LB: > { %s974_s22 = sadd.s32 4294967295, %s912_s21   ;;  %s563_s23 = sadd.s32 4294967294, %s912_s21   ;;  %s912_s21 = sphi %s959_s21, %s1220_s21   ;;  %s908_s20 = sphi %s957_s20, %s1219_s20   ;;  %s904_s19 = sphi %s955_s19, %s1218_s19   ;;  %s900_s18 = sphi %s953_s18, %s1217_s18  }
   0x7   : > { %p42_p0 = scmp.ne.s32.totalorder %s904_s19, %s900_s18  ;;  %p1201_p1 = scmp.eq.s32.totalorder %s974_s22, 0 }
   0x8   : > { %p156_p3 = scmp.eq.s32.totalorder %s563_s23, 1  ;;  %p564_p5 = scmp.ge.s32.totalorder %s912_s21, 1 }
   0x9   : > { %p983_p4 = por %p1201_p1, %p42_p0  ;;  %p163_p7 = scmp.lt.s32.totalorder %s912_s21, 3 }
   0xa   : > { %p988_p6 = por %p156_p3, %p42_p0  ;;  %s914_s27 = smov [#allocation5]  }
   0xb   : > { %s1204_s24 = scalar_select %p983_p4, 1, 0 }
   0xc   : > { %s1205_s25 = scalar_select %p988_p6, 1, 0 }
   0xd   : > { %p993_p8 = pnand %p564_p5, %p163_p7  ;;  %s175_s28 = sshll.u32 %s914_s27, 4  ;;  %s997_s28 = int_to_ptr.vmem [resolvable:$true] %s175_s28 }
   0xe   : > { %s915_s30 = smov [#allocation7]   ;;  %s756_s9 = scalar_lea.hbm %s1196_s1, 512 }
   0xf   : > { %p692_p9 = pneg %p993_p8  ;;  %s191_s6 = sshll.u32 %s915_s30, 4  ;;  %s1008_s6 = int_to_ptr.vmem [resolvable:$true] %s191_s6 }
  0x10   : > { %p757_p12 = scmp.ne.s32.totalorder %s1196_s1, %s756_s9  ;;  %p763_p5 = scmp.lt.u32.totalorder %s756_s9, %s1196_s1 }
  0x11   : > { %p1004_p11 = pnand %p692_p9, %p1201_p1 }
  0x13   : > { %p758_p13 = pneg %p1004_p11 }
  0x15   : > { %p759_p0 = pnand %p758_p13, %p757_p12 }
  0x17   : > { %p760_p3 = pneg %p759_p0 }
  0x19   : > { %p765_p7 = pnand %p763_p5, %p760_p3 }
  0x1b   : > { %768 = shalt.err (!%p765_p7)
}
  0x1c   : > { %s769_s14 = scalar_lea.vmem %s997_s28, 512  ;;  %p777_p2 = scmp.lt.s32.totalorder %s997_s28, %s997_s28 }
  0x1d   : > { %p770_p9 = scmp.ne.s32.totalorder %s997_s28, %s769_s14  ;;  %p778_p12 = scmp.lt.s32.totalorder %s769_s14, %s769_s14 }
  0x1f   : > { %p772_p10 = pnand %p770_p9, %p758_p13  ;;  %p779_p0 = por %p778_p12, %p777_p2 }
  0x21   : > { %p773_p1 = pneg %p772_p10 }
  0x23   : > { %p780_p6 = pnand %p779_p0, %p773_p1 }
  0x25   : > { %783 = shalt.err (!%p780_p6)
}
  0x26   : > { %s916_s15 = smov 128   ;;  %s917_s16 = smov 8  }
  0x27   : > { %695 = dma.hbm_to_vmem [thread:$0]  (!%p1004_p11), %s1196_s1, 512, %s997_s28, [#allocation6], %s916_s15, %s916_s15, %s917_s16  }
  0x28   : > { %s784_s7 = scalar_lea.hbm %s1198_s3, 2048 }
  0x29   : > { %p785_p2 = scmp.ne.s32.totalorder %s1198_s3, %s784_s7  ;;  %p791_p10 = scmp.lt.u32.totalorder %s784_s7, %s1198_s3 }
  0x2b   : > { %p787_p1 = pnand %p785_p2, %p758_p13 }
  0x2d   : > { %p788_p6 = pneg %p787_p1 }
  0x2f   : > { %p793_p3 = pnand %p791_p10, %p788_p6 }
  0x31   : > { %796 = shalt.err (!%p793_p3)
}
  0x32   : > { %s797_s28 = scalar_lea.vmem %s1008_s6, 2048  ;;  %p805_p12 = scmp.lt.s32.totalorder %s1008_s6, %s1008_s6 }
  0x33   : > { %p798_p5 = scmp.ne.s32.totalorder %s1008_s6, %s797_s28  ;;  %p806_p0 = scmp.lt.s32.totalorder %s797_s28, %s797_s28 }
  0x35   : > { %p800_p7 = pnand %p798_p5, %p758_p13  ;;  %p807_p2 = por %p806_p0, %p805_p12 }
  0x37   : > { %p801_p9 = pneg %p800_p7 }
  0x39   : > { %p808_p1 = pnand %p807_p2, %p801_p9 }
  0x3b   : > { %811 = shalt.err (!%p808_p1)
}
  0x3c   : > { %698 = dma.hbm_to_vmem [thread:$0]  (!%p1004_p11), %s1198_s3, 2048, %s1008_s6, [#allocation6], %s916_s15, %s916_s15, %s917_s16  }
  0x3d   : > { %s1063_s14 = sadd.s32 1, %s912_s21   ;;  %s29_s29 = sadd.s32 1, %s908_s20 }
  0x3e   : > { %s26_s17 = ssub.s32 %s912_s21, %s1063_s14  ;;  %p36_p13 = scmp.ne.s32.totalorder %s908_s20, %s904_s19 }
  0x3f   : > { %p27_p6 = scmp.eq.s32.totalorder %s26_s17, 0  ;;  %p37_p10 = scmp.eq.s32.totalorder %s912_s21, 0 }
  0x40   : > { %p1208_p3 = scmp.eq.s32.totalorder %s974_s22, 1  ;;  %p709_p7 = scmp.lt.s32.totalorder %s912_s21, 2 }
  0x41   : > { %s1079_s27 = scalar_select %p27_p6, %s908_s20, %s29_s29  }
  0x42   : > { %p1073_p5 = por %p1208_p3, %p36_p13  ;;  %p38_p9 = por %p37_p10, %p36_p13 }
  0x43   : > { %s208_s30 = sand.u32 1, %s908_s20   ;;  %s569_s6 = sshll.u32 %s912_s21, 7 }
  0x44   : > { %s1209_s23 = scalar_select %p1073_p5, 1, 0 }
  0x45   : > { %s568_s7 = sshll.u32 %s208_s30, 3  ;;  %s1086_s8 = scalar_lea.hbm %s1195_s0, %s569_s6 }
  0x46   : > { %s212_s9 = scalar_lea.vmem [#allocation2], %s568_s7  ;;  %p1090_p11 = pnand %p709_p7, %p38_p9 }
  0x47   : > { %s219_s10 = sshll.u32 %s212_s9, 4  ;;  %s209_s28 = scalar_lea.sflag [#allocation3], %s208_s30  ;;  %s1088_s10 = int_to_ptr.vmem [resolvable:$true] %s219_s10 }
  0x48   : > { %s812_s12 = scalar_lea.hbm %s1086_s8, 128  ;;  %p814_p0 = pneg %p1090_p11 }
  0x49   : > { %p813_p12 = scmp.ne.s32.totalorder %s1086_s8, %s812_s12  ;;  %s817_s17 = scalar_lea.hbm %s1195_s0, 256 }
  0x4a   : > { %p818_p13 = scmp.lt.u32.totalorder %s1086_s8, %s1195_s0  ;;  %p819_p6 = scmp.lt.u32.totalorder %s817_s17, %s812_s12 }
  0x4b   : > { %p815_p2 = pnand %p814_p0, %p813_p12  ;;  %p821_p3 = scmp.lt.u32.totalorder %s812_s12, %s1086_s8 }
  0x4c   : > { %p820_p10 = por %p819_p6, %p818_p13 }
  0x4d   : > { %p816_p1 = pneg %p815_p2 }
  0x4e   : > { %p822_p7 = por %p821_p3, %p820_p10 }
  0x50   : > { %p823_p9 = pnand %p822_p7, %p816_p1 }
  0x52   : > { %826 = shalt.err (!%p823_p9)
}
  0x53   : > { %s827_s30 = scalar_lea.vmem %s1088_s10, 128  ;;  %s918_s15 = smov [#allocation2]  }
  0x54   : > { %p828_p12 = scmp.ne.s32.totalorder %s1088_s10, %s827_s30  ;;  %s832_s16 = sshll.u32 %s918_s15, 4  ;;  %s833_s16 = int_to_ptr.vmem [resolvable:$false] %s832_s16 }
  0x55   : > { %s834_s9 = scalar_lea.vmem %s833_s16, 256  ;;  %p835_p4 = scmp.lt.s32.totalorder %s1088_s10, %s833_s16 }
  0x56   : > { %p830_p2 = pnand %p828_p12, %p814_p0  ;;  %p836_p13 = scmp.lt.s32.totalorder %s834_s9, %s827_s30 }
  0x58   : > { %p831_p5 = pneg %p830_p2  ;;  %p837_p6 = por %p836_p13, %p835_p4 }
  0x5a   : > { %p838_p10 = pnand %p837_p6, %p831_p5 }
  0x5c   : > { %841 = shalt.err (!%p838_p10)
}
  0x5d   : > { %702 = dma.hbm_to_vmem [thread:$0]  (!%p1090_p11), %s1086_s8, 128, %s1088_s10, %s209_s28  }
  0x5e   : > { %228 = sbr.rel (%p993_p8) target bundleno = 871 (0x367), region = 40  ;;  %s1122_s12 = sand.u32 (!%p993_p8), 1, %s904_s19  }
  0x5f   : > { %s571_s13 = sshll.u32 (!%p993_p8), %s1122_s12, 3  ;;  %s231_s29 = scalar_lea.sflag (!%p993_p8), [#allocation3], %s1122_s12 }
  0x60   : > { %s1128_s17 = scalar_lea.vmem (!%p993_p8), [#allocation2], %s571_s13  ;;  %p1211_p4 = scmp.ne.s32.totalorder (!%p993_p8), %s1204_s24, 0 }
  0x65   : > { %887 = dma.done.wait (%p1211_p4), %s231_s29, 128  }
  0x66   : > { %889 = vsyncadd (%p1211_p4), %s231_s29, 4294967168  ;;  %p1212_p5 = scmp.eq.s32.totalorder %s974_s22, 0 }
  0x68   : > { %891 = dma.done.wait (%p1212_p5), [#allocation6], 2560   ;;  %p1213_p8 = pmov %p1212_p5 }
  0x69   : > { %v919_v0 = vmov 0.0|0.0   ;;  %vm920_vm0 = vmmov 0   ;;  %v921_v1 = vmov 0.0   ;;  %v270_v2 = vld [vmem:[#allocation5] sm:$0xff]  ;;  %v271_v3 = vld [vmem:[#allocation5 + $0x8] sm:$0xff]  ;;  %v272_v4 = vld [vmem:[#allocation5 + $0x10] sm:$0xff] }
  0x6a   : > { %893 = vsyncadd (%p1213_p8), [#allocation6], 4294964736  ;;  %650 = vmatprep.subr.bf16.mxu0 %v919_v0  ;;  %612 = vmatprep.mubr.msk.f32.mxu0 %vm920_vm0, %v921_v1  ;;  %v651_v5 = vpack.c.bf16 %v271_v3, %v270_v2  ;;  %v273_v6 = vld [vmem:[#allocation5 + $0x18] sm:$0xff]  ;;  %v356_v7 = vld [vmem:[#allocation7] sm:$0xff]  ;;  %vm281_vm1 = vcmask 261120   ;;  %s579_s11 = sshll.u32 %s974_s22, 7 }
  0x6b   : > { %656 = vmatprep.subr.bf16.mxu1 %v919_v0  ;;  %647 = vmatprep.mubr.msk.f32.mxu1 %vm920_vm0, %v921_v1  ;;  %v357_v8 = vld [vmem:[#allocation7 + $0x8] sm:$0xff]  ;;  %v358_v9 = vld [vmem:[#allocation7 + $0x10] sm:$0xff]  ;;  %v359_v10 = vld [vmem:[#allocation7 + $0x18] sm:$0xff]  ;;  %v654_v11 = vpack.c.bf16 %v273_v6, %v272_v4  ;;  %s268_s28 = scalar_lea.vmem [#allocation8], %s571_s13  ;;  %s1151_s15 = scalar_lea.hbm %s1200_s5, %s579_s11 }
  0x6c   : > { %652 = vmatpush3.bf16.msra.mxu0 %v651_v5  ;;  %v657_v12 = vpack.c.bf16 %v357_v8, %v356_v7  ;;  %v660_v13 = vpack.c.bf16 %v359_v10, %v358_v9  ;;  %v360_v14 = vld [vmem:[#allocation7 + $0x20] sm:$0xff]  ;;  %v361_v15 = vld [vmem:[#allocation7 + $0x28] sm:$0xff]  ;;  %v269_v16 = vld [vmem:[%s1128_s17] sm:$0xff]  ;;  %s474_s7 = sshll.u32 %s268_s28, 4  ;;  %s461_s16 = scalar_lea.sflag [#allocation4], %s1122_s12  ;;  %s1153_s7 = int_to_ptr.vmem [resolvable:$true] %s474_s7 }
  0x6d   : > { %653 = vmatprep.subr.bf16.mxu0 %v919_v0  ;;  %v663_v17 = vpack.c.bf16 %v361_v15, %v360_v14  ;;  %v362_v18 = vld [vmem:[#allocation7 + $0x30] sm:$0xff]  ;;  %v363_v19 = vld [vmem:[#allocation7 + $0x38] sm:$0xff]  ;;  %v364_v21 = vld [vmem:[#allocation7 + $0x40] sm:$0xff]  ;;  %s842_s9 = scalar_lea.vmem %s1153_s7, 128  ;;  %p1214_p0 = scmp.ne.s32.totalorder %s1209_s23, 0 }
  0x6e   : > { %658 = vmatpush3.bf16.msra.mxu1 %v657_v12  ;;  %v666_v20 = vpack.c.bf16 %v363_v19, %v362_v18  ;;  %v365_v22 = vld [vmem:[#allocation7 + $0x48] sm:$0xff]  ;;  %v366_v24 = vld [vmem:[#allocation7 + $0x50] sm:$0xff]  ;;  %v367_v25 = vld [vmem:[#allocation7 + $0x58] sm:$0xff]  ;;  %p843_p11 = scmp.ne.s32.totalorder %s1153_s7, %s842_s9  ;;  %s922_s22 = smov [#allocation8]  }
  0x6f   : > { %659 = vmatprep.subr.bf16.mxu1 %v919_v0  ;;  %v669_v23 = vpack.c.bf16 %v365_v22, %v364_v21  ;;  %v672_v26 = vpack.c.bf16 %v367_v25, %v366_v24  ;;  %v368_v27 = vld [vmem:[#allocation7 + $0x60] sm:$0xff]  ;;  %v369_v28 = vld [vmem:[#allocation7 + $0x68] sm:$0xff]  ;;  %v370_v30 = vld [vmem:[#allocation7 + $0x70] sm:$0xff]  ;;  %s846_s13 = sshll.u32 %s922_s22, 4  ;;  %s847_s13 = int_to_ptr.vmem [resolvable:$false] %s846_s13 }
  0x70   : > { %655 = vmatpush3.bf16.msra.mxu0 %v654_v11  ;;  %v675_v29 = vpack.c.bf16 %v369_v28, %v368_v27  ;;  %v371_v31 = vld [vmem:[#allocation7 + $0x78] sm:$0xff]  ;;  %v575_v33 = vld [vmem:[%s1197_s2] ss:$0 sm:$0xff]  ;;  %p844_p1 = pnand %p843_p11, %p1214_p0  ;;  %s848_s29 = scalar_lea.vmem %s847_s13, 256 }
  0x71   : > { %v678_v32 = vpack.c.bf16 %v371_v31, %v370_v30  ;;  %v577_v38 = vld [vmem:[%s1199_s4] ss:$0 sm:$0xff]  ;;  %p849_p7 = scmp.lt.s32.totalorder %s1153_s7, %s847_s13  ;;  %p850_p9 = scmp.lt.s32.totalorder %s848_s29, %s842_s9 }
  0x72   : > { %661 = vmatpush3.bf16.msra.mxu1 %v660_v13  ;;  %p845_p3 = pneg %p844_p1 }
  0x73   : > { %613 = vmatmul.mubr.msk.f32.vlgmr.msra.gmra.mrb[0].mxu0 %vm281_vm1, %v269_v16  ;;  %662 = vmatprep.subr.bf16.mxu1 %v919_v0  ;;  %p851_p12 = por %p850_p9, %p849_p7 }
  0x75   : > { %p852_p2 = pnand %p851_p12, %p845_p3 }
  0x76   : > { %664 = vmatpush3.bf16.msra.mxu1 %v663_v17 }
  0x77   : > { %665 = vmatprep.subr.bf16.mxu1 %v919_v0 }
  0x7a   : > { %667 = vmatpush3.bf16.msra.mxu1 %v666_v20 }
  0x7b   : > { %668 = vmatprep.subr.bf16.mxu1 %v919_v0 }
  0x7e   : > { %670 = vmatpush3.bf16.msra.mxu1 %v669_v23 }
  0x7f   : > { %671 = vmatprep.subr.bf16.mxu1 %v919_v0 }
  0x82   : > { %673 = vmatpush3.bf16.msra.mxu1 %v672_v26 }
  0x83   : > { %674 = vmatprep.subr.bf16.mxu1 %v919_v0 }
  0x86   : > { %676 = vmatpush3.bf16.msra.mxu1 %v675_v29 }
  0x87   : > { %677 = vmatprep.subr.bf16.mxu1 %v919_v0 }
  0x8a   : > { %679 = vmatpush3.bf16.msra.mxu1 %v678_v32 }
 0x146   : > { %v351_v34 = vpop.f32.mrb[0].mxu0 }
 0x147   : > { %v352_v35 = vadd.f32 %v575_v33, %v351_v34  ;;  %v614_v36 = vpop.f32.mrb[1].mxu0 }
 0x149   : > { %v355_v37 = vmax.f32 %v352_v35, 0.0 }
 0x14b   : > { %648 = vmatmul.mubr.f32.vlgmr.msra.gmra.mrb[0].mxu1 %v355_v37 }
 0x21e   : > { %v445_v39 = vpop.f32.mrb[0].mxu1 }
 0x21f   : > { %v446_v40 = vadd.f32 %v577_v38, %v445_v39  ;;  %v649_v41 = vpop.f32.mrb[1].mxu1 }
 0x221   : > { %449 = vmax.xlane.f32.xlu0 %v446_v40 }
 0x2ae   : > { %v450_v42 = vpop.xlane.xlu0 %449 }
 0x2af   : > { %v451_v43 = vsub.f32 %v446_v40, %v450_v42 }
 0x2b1   : > { %v452_v44 = vmul.f32 1.442695, %v451_v43 }
 0x2b3   : > { %752 = vpow2.f32 %v452_v44 }
 0x2bd   : > { %v753_v45 = vpop.eup %752 }
 0x2be   : > { %454 = vadd.xlane.f32.xlu0 %v753_v45 }
 0x34b   : > { %v455_v46 = vpop.xlane.xlu0 %454 }
 0x34c   : > { %754 = vrcp.f32 %v455_v46 }
 0x356   : > { %v755_v47 = vpop.eup %754 }
 0x357   : > { %v458_v48 = vmul.f32 %v755_v47, %v753_v45 }
 0x359   : > { %459 = vst [vmem:[%s268_s28] sm:$0xff] %v458_v48 }
 0x35a   : > { %855 = shalt.err (!%p852_p2)
}
 0x35b   : > { %s856_s12 = scalar_lea.hbm %s1151_s15, 128  ;;  %s860_s26 = scalar_lea.hbm %s1200_s5, 256 }
 0x35c   : > { %p857_p13 = scmp.ne.s32.totalorder %s1151_s15, %s856_s12  ;;  %p861_p4 = scmp.lt.u32.totalorder %s1151_s15, %s1200_s5 }
 0x35d   : > { %p862_p5 = scmp.lt.u32.totalorder %s860_s26, %s856_s12  ;;  %p864_p11 = scmp.lt.u32.totalorder %s856_s12, %s1151_s15 }
 0x35e   : > { %p858_p6 = pnand %p857_p13, %p1214_p0 }
 0x35f   : > { %p863_p8 = por %p862_p5, %p861_p4 }
 0x360   : > { %p859_p10 = pneg %p858_p6 }
 0x361   : > { %p865_p1 = por %p864_p11, %p863_p8 }
 0x363   : > { %p866_p3 = pnand %p865_p1, %p859_p10 }
 0x365   : > { %869 = shalt.err (!%p866_p3)
}
 0x366   : > { %690 = dma.vmem_to_hbm [thread:$0]  (%p1214_p0), %s1153_s7, 128, %s1151_s15, %s461_s16  }
 0x367 PF: > { %s486_s11 = sand.u32 1, %s900_s18   ;;  %p1215_p7 = scmp.ne.s32.totalorder %s1205_s25, 0 }
 0x368   : > { %p1216_p9 = scmp.ge.s32.totalorder %s912_s21, 2  ;;  %s487_s28 = scalar_lea.sflag [#allocation4], %s486_s11 }
 0x36a   : > { %p704_p12 = pnand %p1216_p9, %p1215_p7 }
 0x36c   : > { %895 = dma.done.wait (!%p704_p12), %s487_s28, 128  }
 0x36d   : > { %897 = vsyncadd (!%p704_p12), %s487_s28, 4294967168  ;;  %p19_p2 = scmp.ge.s32.totalorder %s1063_s14, 4   ;;  %s1217_s18 = smov %s904_s19 }
 0x36e   : > { %s1218_s19 = smov %s908_s20  ;;  %s1219_s20 = smov %s1079_s27 }
 0x36f   : > { %s1220_s21 = smov %s1063_s14  ;;  %21 = sbr.rel (!%p19_p2) target bundleno = 6 (0x6), region = 93 }
 0x376   :  { %492 = vsyncpa [#allocation3], 1 }
 0x377   :  { %494 = vsyncpa [#allocation3 + $0x1], 1 }
 0x378   :  { %495 = vsyncpa [#allocation6], 1 }
 0x379   :  { %496 = vsyncpa [#allocation4], 1 }
 0x37a   :  { %498 = vsyncpa [#allocation4 + $0x1], 1 }

</bundles_post_ra>
